<compile_context>
chip_gen: v7x
topology: tpu7x:2x2x1
jax: 0.10.0
libtpu: 0.0.40
codegen_flags: <defaults>
</compile_context>

<pallas_src>
import functools

import jax
import jax.numpy as jnp
from jax.experimental import pallas as pl
from jax.experimental.pallas import tpu as pltpu


def _exp_kernel(x_ref, o_ref):
    # Pure elementwise exp on the VMEM tile (EUP; kernel is HBM-bandwidth bound).
    o_ref[...] = jnp.exp(x_ref[...])


def _sublane_multiple(dtype) -> int:
    # 32-bit -> 8 sublanes/vreg, 16-bit -> 16, 8-bit -> 32.
    return max(8, 32 // jnp.dtype(dtype).itemsize)


def _choose_width(n: int) -> int:
    # Widest lane-dense last dim (multiple of 128) that evenly divides n.
    for w in (8192, 4096, 2048, 1024, 512, 256, 128):
        if n % w == 0:
            return w
    return 0  # element count not a multiple of 128 -> ragged 1-D path


@functools.lru_cache(maxsize=1)
def _tpu_generation_params():
    """Return (target_block_bytes, vmem_limit_bytes_or_None, tensorcores_per_device)."""
    kind = ""
    try:
        kind = jax.devices()[0].device_kind.lower()
    except Exception:
        pass
    if "v7" in kind or "7x" in kind:
        # v7x: 3.2 TB/s HBM -> bigger blocks; raise the 32 MiB scoped default
        # explicitly but stay well under the 64 MiB physical per-TC VMEM.
        # (6 MiB block, in+out double-buffered = 24 MiB.)
        return 6 * 1024 * 1024, 48 * 1024 * 1024, 2
    if "v6" in kind:
        # v6e: 4 MiB blocks -> 16 MiB with double buffering, fits the 32 MiB
        # scoped default without touching vmem_limit_bytes.
        return 4 * 1024 * 1024, None, 1
    # v5e / older / unknown: 16 MiB scoped default -> keep blocks ~2 MiB.
    return 2 * 1024 * 1024, None, 1


def _compiler_params(vmem_limit):
    kwargs = dict(dimension_semantics=(pltpu.PARALLEL,))
    if vmem_limit is not None:
        kwargs["vmem_limit_bytes"] = vmem_limit
    return pltpu.CompilerParams(**kwargs)


def _run_exp_2d(x2d: jax.Array, *, block_bytes: int, vmem_limit, cores: int,
                inplace: bool) -> jax.Array:
    rows, cols = x2d.shape
    itemsize = jnp.dtype(x2d.dtype).itemsize
    sub = _sublane_multiple(x2d.dtype)

    # Rows per block so one block is ~block_bytes, rounded down to the
    # dtype-dependent sublane multiple.
    block_rows = max(1, block_bytes // (cols * itemsize))
    block_rows = max(sub, (block_rows // sub) * sub)

    if cores > 1:
        # Keep the grid at least 2x the TensorCore count so the parallel grid
        # axis gives every core work (v7x megacore); no-op on 1-TC chips.
        cap = ((rows // (2 * cores)) // sub) * sub
        if cap >= sub:
            block_rows = min(block_rows, cap)

    if block_rows >= rows:
        block_rows = rows  # full-extent block is always legal

    n = rows * cols
    grid = (pl.cdiv(rows, block_rows),)  # Pallas masks the ragged last row-block.

    return pl.pallas_call(
        _exp_kernel,
        out_shape=jax.ShapeDtypeStruct((rows, cols), x2d.dtype),
        grid=grid,
        in_specs=[pl.BlockSpec((block_rows, cols), lambda i: (i, 0))],
        out_specs=pl.BlockSpec((block_rows, cols), lambda i: (i, 0)),
        compiler_params=_compiler_params(vmem_limit),
        cost_estimate=pl.CostEstimate(
            flops=0, transcendentals=n, bytes_accessed=2 * n * itemsize),
        input_output_aliases={0: 0} if inplace else {},
    )(x2d)


def _run_exp_1d(flat: jax.Array, *, block_bytes: int, vmem_limit,
                inplace: bool) -> jax.Array:
    # Ragged path: 1-D flat array, block a multiple of a full (8x128) tile,
    # grid = cdiv(n, block); Pallas masks the ragged final block's stores so
    # there is exactly one HBM read + one HBM write (no pad / slice passes).
    (n,) = flat.shape
    itemsize = jnp.dtype(flat.dtype).itemsize
    chunk = 8 * 128
    block = max(chunk, ((block_bytes // itemsize) // chunk) * chunk)
    if block >= n:
        block = n  # full-array block (always a legal block shape)
    grid = (pl.cdiv(n, block),)

    return pl.pallas_call(
        _exp_kernel,
        out_shape=jax.ShapeDtypeStruct((n,), flat.dtype),
        grid=grid,
        in_specs=[pl.BlockSpec((block,), lambda i: (i,))],
        out_specs=pl.BlockSpec((block,), lambda i: (i,)),
        compiler_params=_compiler_params(vmem_limit),
        cost_estimate=pl.CostEstimate(
            flops=0, transcendentals=n, bytes_accessed=2 * n * itemsize),
        input_output_aliases={0: 0} if inplace else {},
    )(flat)


def exponential(x: jax.Array, *, inplace: bool = False,
                min_pallas_bytes: int = 512 * 1024) -> jax.Array:
    """Elementwise exp(x) via a Pallas TPU kernel. Matches torch.exp(input).

    `inplace=True` mirrors the torch flag by aliasing the output onto the
    input buffer (input_output_aliases); results are identical either way.
    """
    if jnp.issubdtype(x.dtype, jnp.complexfloating):
        # TODO(synk): complex exp has no clean Pallas TPU lowering; defer to XLA.
        return jnp.exp(x)
    if not jnp.issubdtype(x.dtype, jnp.floating):
        # torch.exp promotes integer/bool inputs to the default float dtype.
        x = x.astype(jnp.float32)

    orig_shape = x.shape
    n = x.size
    if n == 0:
        return x
    itemsize = jnp.dtype(x.dtype).itemsize

    # Tiny tensors: pallas_call launch/grid bookkeeping dominates; XLA's fused
    # elementwise exp is as fast or faster.
    if n * itemsize < min_pallas_bytes:
        return jnp.exp(x)

    block_bytes, vmem_limit, cores = _tpu_generation_params()

    w = _choose_width(n)
    if w:
        # Fast path: free contiguous reshape to a wide, lane-dense 2-D view;
        # every block spans the full width so each DMA is one contiguous chunk.
        out2d = _run_exp_2d(x.reshape(n // w, w), block_bytes=block_bytes,
                            vmem_limit=vmem_limit, cores=cores, inplace=inplace)
        return out2d.reshape(orig_shape)

    # Ragged element count: single-pass masked 1-D kernel.
    out = _run_exp_1d(x.reshape(-1), block_bytes=block_bytes,
                      vmem_limit=vmem_limit, inplace=inplace)
    return out.reshape(orig_shape)


if __name__ == "__main__":
    key = jax.random.PRNGKey(0)
    k1, k2, k3, k4 = jax.random.split(key, 4)

    # 1) Small NCHW-like input (the module's typical use): auto path takes the
    #    small-input bypass; also force the Pallas kernel on the same shape.
    x_small = jax.random.normal(k1, (2, 4, 16, 16), dtype=jnp.float32)
    ref_small = jnp.exp(x_small)
    y_auto = jax.block_until_ready(exponential(x_small))
    y_pallas = jax.block_until_ready(exponential(x_small, min_pallas_bytes=0))
    assert y_auto.shape == x_small.shape and y_auto.dtype == x_small.dtype
    assert jnp.allclose(y_auto, ref_small, rtol=1e-6, atol=1e-6)
    assert jnp.allclose(y_pallas, ref_small, rtol=1e-6, atol=1e-6)

    # 2) Medium input on the lane-dense 2-D fast path (+ aliased `inplace` run).
    x_med = jax.random.normal(k2, (2, 4, 128, 256), dtype=jnp.float32)
    ref_med = jnp.exp(x_med)
    y_med = jax.block_until_ready(exponential(x_med))
    y_med_ip = jax.block_until_ready(exponential(x_med, inplace=True))
    assert jnp.allclose(y_med, ref_med, rtol=1e-6, atol=1e-6)
    assert jnp.allclose(y_med_ip, ref_med, rtol=1e-6, atol=1e-6)

    # 3) Ragged element counts (n % 128 != 0): in-kernel masked 1-D path.
    x_rag_small = jax.random.normal(k3, (3, 5, 7), dtype=jnp.float32)
    y_rag_small = jax.block_until_ready(exponential(x_rag_small, min_pallas_bytes=0))
    assert y_rag_small.shape == x_rag_small.shape
    assert jnp.allclose(y_rag_small, jnp.exp(x_rag_small), rtol=1e-6, atol=1e-6)

    x_rag_big = jax.random.normal(k4, (600017,), dtype=jnp.float32)
    y_rag_big = jax.block_until_ready(exponential(x_rag_big))
    assert jnp.allclose(y_rag_big, jnp.exp(x_rag_big), rtol=1e-6, atol=1e-6)

    # 4) Integer input promotes to float32 (torch.exp semantics).
    x_int = (jnp.arange(2 * 4 * 16 * 16, dtype=jnp.int32) % 7).reshape(2, 4, 16, 16)
    y_int = jax.block_until_ready(exponential(x_int))
    assert y_int.dtype == jnp.float32
    assert jnp.allclose(y_int, jnp.exp(x_int.astype(jnp.float32)), rtol=1e-6, atol=1e-6)

    print("KERNEL_OK")
</pallas_src>

<mosaic_0001>
module attributes {stable_mosaic.version = 11 : i64} {
  func.func @_exp_kernel(%arg0: i32, %arg1: memref<1x2048xf32, #tpu.memory_space<vmem>>, %arg2: memref<1x2048xf32, #tpu.memory_space<vmem>>) attributes {dimension_semantics = [#tpu.dimension_semantics<parallel>], iteration_bounds = array<i64: 1>, scalar_prefetch = 0 : i64, scratch_operands = 0 : i64, tpu.core_type = #tpu.core_type<tc>, window_params = [{transform_indices = @transform_0, window_bounds = array<i64: 1, 2048>}, {transform_indices = @transform_1, window_bounds = array<i64: 1, 2048>}]} {
    %c0 = arith.constant 0 : index
    %c0_0 = arith.constant 0 : index
    %0 = vector.load %arg1[%c0, %c0_0] : memref<1x2048xf32, #tpu.memory_space<vmem>>, vector<1x2048xf32>
    %1 = math.exp %0 : vector<1x2048xf32>
    %c0_1 = arith.constant 0 : index
    %c0_2 = arith.constant 0 : index
    %2 = vector.load %arg2[%c0_1, %c0_2] : memref<1x2048xf32, #tpu.memory_space<vmem>>, vector<1x2048xf32>
    tpu.vector_store %arg2[%c0_1, %c0_2], %1 {strides = array<i32>} : memref<1x2048xf32, #tpu.memory_space<vmem>>, vector<1x2048xf32>,
    return
  }
  func.func @transform_0(%arg0: i32) -> (i32, i32) {
    %c0_i32 = arith.constant 0 : i32
    %c0_i32_0 = arith.constant 0 : i32
    return %arg0, %c0_i32 : i32, i32
  }
  func.func @transform_1(%arg0: i32) -> (i32, i32) {
    %c0_i32 = arith.constant 0 : i32
    %c0_i32_0 = arith.constant 0 : i32
    return %arg0, %c0_i32 : i32, i32
  }
}

</mosaic_0001>

<bundles_post_ra>
// kernel: tpu_custom_call.1
= control target key start
LH: loop header
LB: loop body
LE: loop exit
PB: predicated region body
PF: predicated region fallthrough
CT: control target
= control target key end

     0   :  { %6 = vsyncpa [#allocation3], 0  ;;  %s134_s0 = inlined_call_operand.hbm [shape: f32[1,2048], index: 0, kind: input, shape index: {}]   ;;  %s135_s1 = inlined_call_operand.hbm [shape: f32[1,2048], index: 1, kind: output, shape index: {}]  }
   0x1   :  { %7 = vsyncpa [#allocation4], 0  ;;  %s98_s6 = smov [#allocation2]   ;;  %s50_s10 = scalar_lea.hbm %s134_s0, 256 }
   0x2   :  { %s14_s7 = sshll.u32 %s98_s6, 4  ;;  %p51_p0 = scmp.ne.s32.totalorder %s134_s0, %s50_s10  ;;  %s15_s7 = int_to_ptr.vmem [resolvable:$true] %s14_s7 }
   0x3   :  { %p54_p1 = scmp.lt.u32.totalorder %s50_s10, %s134_s0 }
   0x5   :  { %p56_p2 = pnand %p54_p1, %p51_p0 }
   0x7   :  { %59 = shalt.err (!%p56_p2)
}
   0x8   :  { %s60_s15 = scalar_lea.vmem %s15_s7, 256  ;;  %p65_p4 = scmp.lt.s32.totalorder %s15_s7, %s15_s7 }
   0x9   :  { %p61_p3 = scmp.ne.s32.totalorder %s15_s7, %s60_s15  ;;  %p66_p5 = scmp.lt.s32.totalorder %s60_s15, %s60_s15 }
   0xb   :  { %p67_p6 = por %p66_p5, %p65_p4 }
   0xd   :  { %p68_p7 = pnand %p67_p6, %p61_p3 }
   0xf   :  { %71 = shalt.err (!%p68_p7)
}
  0x10   :  { %17 = dma.hbm_to_vmem [thread:$0]  %s134_s0, 256, %s15_s7, [#allocation3]  }
  0x11   :  { %94 = dma.done.wait [#allocation3], 256  }
  0x12   :  { %95 = vsyncadd [#allocation3], 4294967040  ;;  %v21_v0 = vld [vmem:[#allocation2] sm:$0xff]  ;;  %v22_v1 = vld [vmem:[#allocation2 + $0x8] sm:$0xff]  ;;  %s99_s18 = smov [#allocation5]  }
  0x13   :  { %v23_v2 = vmul.f32 1.442695, %v21_v0  ;;  %v25_v3 = vmul.f32 1.442695, %v22_v1  ;;  %s35_s19 = sshll.u32 %s99_s18, 4  ;;  %s36_s19 = int_to_ptr.vmem [resolvable:$true] %s35_s19 }
  0x14   :  { %s72_s20 = scalar_lea.vmem %s36_s19, 256  ;;  %p77_p9 = scmp.lt.s32.totalorder %s36_s19, %s36_s19 }
  0x15   :  { %46 = vpow2.f32 %v23_v2  ;;  %p73_p8 = scmp.ne.s32.totalorder %s36_s19, %s72_s20  ;;  %p78_p10 = scmp.lt.s32.totalorder %s72_s20, %s72_s20 }
  0x16   :  { %48 = vpow2.f32 %v25_v3 }
  0x17   :  { %p79_p11 = por %p78_p10, %p77_p9 }
  0x19   :  { %p80_p12 = pnand %p79_p11, %p73_p8 }
  0x1f   :  { %v47_v4 = vpop.eup %46 }
  0x20   :  { %v49_v5 = vpop.eup %48  ;;  %27 = vst [vmem:[#allocation5] sm:$0xff] %v47_v4 }
  0x21   :  { %28 = vst [vmem:[#allocation5 + $0x8] sm:$0xff] %v49_v5 }
  0x22   :  { %83 = shalt.err (!%p80_p12)
}
  0x23   :  { %s84_s22 = scalar_lea.hbm %s135_s1, 256 }
  0x24   :  { %p85_p13 = scmp.ne.s32.totalorder %s135_s1, %s84_s22  ;;  %p88_p0 = scmp.lt.u32.totalorder %s84_s22, %s135_s1 }
  0x26   :  { %p90_p1 = pnand %p88_p0, %p85_p13 }
  0x28   :  { %93 = shalt.err (!%p90_p1)
}
  0x29   :  { %38 = dma.vmem_to_hbm [thread:$0]  %s36_s19, 256, %s135_s1, [#allocation4]  }
  0x2a   :  { %96 = dma.done.wait [#allocation4], 256  }
  0x2b   :  { %97 = vsyncadd [#allocation4], 4294967040 }
  0x2c   :  { %42 = vsyncpa [#allocation3], 1 }
  0x2d   :  { %43 = vsyncpa [#allocation4], 1 }

</bundles_post_ra>
